<compile_context>
chip_gen: v6e
topology: v6e:2x2x1
jax: 0.10.0
libtpu: 0.0.40
codegen_flags: <defaults>
</compile_context>

<pallas_src>
import functools
import math

import numpy as np
import jax
import jax.numpy as jnp
from jax.experimental import pallas as pl
from jax.experimental.pallas import tpu as pltpu

LEAKY_SLOPE = 0.01      # nn.LeakyReLU default
BN_EPS = 1e-5           # nn.BatchNorm1d default
LANE = 128
VMEM_LIMIT = 32 * 1024 * 1024


def _round_up(x, m):
    return ((x + m - 1) // m) * m


def _pad_last(a, target):
    pad = target - a.shape[-1]
    if pad == 0:
        return a
    return jnp.pad(a, [(0, 0)] * (a.ndim - 1) + [(0, pad)])


def _pick_row_tile(n_rows):
    # Largest power-of-two tile that still gives >= 2 grid steps (so the
    # accumulator / pipelining path is exercised); min 8 sublanes.
    for tm in (512, 256, 128, 64, 32, 16, 8):
        if n_rows >= 2 * tm:
            return tm
    return 8


def _pack_indices(lengths):
    batch_idx = np.repeat(np.arange(len(lengths)), lengths).astype(np.int32)
    pos_idx = np.concatenate([np.arange(l) for l in lengths]).astype(np.int32)
    return jnp.asarray(batch_idx), jnp.asarray(pos_idx)


# ----------------------------------------------------------------------------
# Pass 1: masked BatchNorm stats for the temporal path (row-tiled reduction)
#         + the full static path MLP (fused, runs once under pl.when).
# Outputs:
#   bn_ref   : (2, CoutP)  row 0 = gamma * rsqrt(var + eps), row 1 = beta - mean*scale
#   ostat_ref: (B, StatOutP)  LeakyReLU(BN(Linear(x_stat)))
# ----------------------------------------------------------------------------
def _stats_static_kernel(x_ref, valid_ref, w_ref, b_ref, g_ref, beta_ref,
                         xs_ref, ws_ref, bs_ref, gs_ref, betas_ref,
                         bn_ref, ostat_ref,
                         sum_ref, sq_ref, *, inv_n):
    i = pl.program_id(0)

    @pl.when(i == 0)
    def _init():
        sum_ref[...] = jnp.zeros_like(sum_ref)
        sq_ref[...] = jnp.zeros_like(sq_ref)
        # Static path: Linear -> BatchNorm1d(train, over B rows) -> LeakyReLU.
        ys = jnp.dot(xs_ref[...], ws_ref[...],
                     preferred_element_type=jnp.float32) + bs_ref[...]
        mu = jnp.mean(ys, axis=0, keepdims=True)
        dev = ys - mu
        var = jnp.mean(dev * dev, axis=0, keepdims=True)
        ysn = dev * jax.lax.rsqrt(var + BN_EPS) * gs_ref[...] + betas_ref[...]
        ostat_ref[...] = jnp.where(ysn >= 0, ysn, LEAKY_SLOPE * ysn)

    # Row-tiled Linear; masked first/second moments over the valid packed rows
    # (padded rows have valid == 0 so they drop out of the statistics).
    y = jnp.dot(x_ref[...], w_ref[...],
                preferred_element_type=jnp.float32) + b_ref[...]
    yv = y * valid_ref[...]
    sum_ref[...] += jnp.sum(yv, axis=0, keepdims=True)
    sq_ref[...] += jnp.sum(yv * y, axis=0, keepdims=True)

    @pl.when(i == pl.num_programs(0) - 1)
    def _finalize():
        mean = sum_ref[...] * inv_n
        var = sq_ref[...] * inv_n - mean * mean           # biased, as in BN train
        scale = g_ref[...] * jax.lax.rsqrt(var + BN_EPS)  # EUP rsqrt
        shift = beta_ref[...] - mean * scale
        bn_ref[...] = jnp.concatenate([scale, shift], axis=0)


def bn_stats_and_static(x_cat_pad, valid_pad, w_t, b_t, g_t, beta_t,
                        x_stat, w_s, b_s, g_s, beta_s, *, n_valid, row_tile):
    bt_pad, cin = x_cat_pad.shape
    coutp = w_t.shape[1]
    bsz, sin = x_stat.shape
    soutp = w_s.shape[1]
    kernel = functools.partial(_stats_static_kernel, inv_n=1.0 / float(n_valid))
    return pl.pallas_call(
        kernel,
        out_shape=(jax.ShapeDtypeStruct((2, coutp), jnp.float32),
                   jax.ShapeDtypeStruct((bsz, soutp), jnp.float32)),
        grid=(bt_pad // row_tile,),
        in_specs=[
            pl.BlockSpec((row_tile, cin), lambda i: (i, 0)),
            pl.BlockSpec((row_tile, 1), lambda i: (i, 0)),
            pl.BlockSpec((cin, coutp), lambda i: (0, 0)),
            pl.BlockSpec((1, coutp), lambda i: (0, 0)),
            pl.BlockSpec((1, coutp), lambda i: (0, 0)),
            pl.BlockSpec((1, coutp), lambda i: (0, 0)),
            pl.BlockSpec((bsz, sin), lambda i: (0, 0)),
            pl.BlockSpec((sin, soutp), lambda i: (0, 0)),
            pl.BlockSpec((1, soutp), lambda i: (0, 0)),
            pl.BlockSpec((1, soutp), lambda i: (0, 0)),
            pl.BlockSpec((1, soutp), lambda i: (0, 0)),
        ],
        out_specs=(pl.BlockSpec((2, coutp), lambda i: (0, 0)),
                   pl.BlockSpec((bsz, soutp), lambda i: (0, 0))),
        scratch_shapes=[pltpu.VMEM((1, coutp), jnp.float32),
                        pltpu.VMEM((1, coutp), jnp.float32)],
        compiler_params=pltpu.CompilerParams(
            dimension_semantics=("arbitrary",),
            vmem_limit_bytes=VMEM_LIMIT),
    )(x_cat_pad, valid_pad, w_t, b_t, g_t, beta_t,
      x_stat, w_s, b_s, g_s, beta_s)


# ----------------------------------------------------------------------------
# Pass 2: per-sequence BN-apply + LeakyReLU + self-attention (grid over B).
#   h      = LeakyReLU(y*scale + shift) * row_valid    (== pad_packed_sequences)
#   qk     = h h^T / sqrt(d)         (bf16 MXU, f32 accumulate, no transpose)
#   attn   = (softmax(qk) + temp_attn) * mask_repeat
#   out_b  = attn @ h                (bf16 MXU, f32 accumulate)
# ----------------------------------------------------------------------------
def _attn_kernel(x_ref, valid_ref, w_ref, b_ref, bn_ref, ta_ref, mask_ref,
                 o_ref, *, inv_sqrt_d):
    # Per-sequence Linear recompute: K = Cin is tiny, cheaper than an HBM
    # round trip of the (B*T, CoutP) activation between the two passes.
    y = jnp.dot(x_ref[...], w_ref[...],
                preferred_element_type=jnp.float32) + b_ref[...]
    bn = bn_ref[...]
    y = y * bn[0:1, :] + bn[1:2, :]
    h = jnp.where(y >= 0, y, LEAKY_SLOPE * y) * valid_ref[...]

    hb = h.astype(jnp.bfloat16)
    # x x^T without an explicit transpose: contract the last dims on the MXU.
    qk = jax.lax.dot_general(hb, hb, (((1,), (1,)), ((), ())),
                             preferred_element_type=jnp.float32) * inv_sqrt_d
    qk_max = jnp.max(qk, axis=-1, keepdims=True)
    e = jnp.exp(qk - qk_max)
    sm = e * pl.reciprocal(jnp.sum(e, axis=-1, keepdims=True), approx=True)

    attn = (sm + ta_ref[0].astype(jnp.float32)) * mask_ref[0].astype(jnp.float32)
    o_ref[...] = jnp.dot(attn.astype(jnp.bfloat16), hb,
                         preferred_element_type=jnp.float32)


def attention_per_sequence(x_cat_pad, valid_pad, w_t, b_t, bn_affine,
                           temp_attn_bf16, mask_bf16, *, B, T, d_model):
    cin, coutp = w_t.shape
    kernel = functools.partial(_attn_kernel,
                               inv_sqrt_d=1.0 / math.sqrt(float(d_model)))
    # NOTE: pipeline_mode=pl.Buffered(3) on the (1,T,T) specs is a tuning knob
    # for large T (exposed DMA); left at the default double buffering here.
    return pl.pallas_call(
        kernel,
        out_shape=jax.ShapeDtypeStruct((B * T, coutp), jnp.float32),
        grid=(B,),
        in_specs=[
            pl.BlockSpec((T, cin), lambda b: (b, 0)),
            pl.BlockSpec((T, 1), lambda b: (b, 0)),
            pl.BlockSpec((cin, coutp), lambda b: (0, 0)),
            pl.BlockSpec((1, coutp), lambda b: (0, 0)),
            pl.BlockSpec((2, coutp), lambda b: (0, 0)),
            pl.BlockSpec((1, T, T), lambda b: (b, 0, 0)),
            pl.BlockSpec((1, T, T), lambda b: (b, 0, 0)),
        ],
        out_specs=pl.BlockSpec((T, coutp), lambda b: (b, 0)),
        compiler_params=pltpu.CompilerParams(
            dimension_semantics=("parallel",),    # v7x: shard sequences on 2 TCs
            vmem_limit_bytes=VMEM_LIMIT),
    )(x_cat_pad, valid_pad, w_t, b_t, bn_affine, temp_attn_bf16, mask_bf16)


# ----------------------------------------------------------------------------
# SimtaPlusLayer forward (Pallas).  lengths are static Python ints.
# ----------------------------------------------------------------------------
def simta_plus_forward(params, x_temp, x_stat, temp_attn, mask_repeat, lengths):
    lengths = [int(l) for l in lengths]
    B, T, _ = temp_attn.shape
    temp_in = x_temp.shape[-1]
    stat_in = x_stat.shape[-1]
    temp_out = params["w_temp"].shape[1]
    stat_out = params["w_stat"].shape[1]
    temp_outp = _round_up(temp_out, LANE)
    stat_outp = _round_up(stat_out, LANE)
    cin = temp_in + stat_in
    n_valid = sum(lengths)

    batch_idx, pos_idx = _pack_indices(lengths)

    # Glue (plain JAX): padded, concatenated temp-path input; padded rows zero.
    valid_np = (np.arange(T)[None, :] <
                np.asarray(lengths)[:, None]).astype(np.float32)       # (B, T)
    x_temp_pad = jnp.zeros((B, T, temp_in), jnp.float32).at[
        batch_idx, pos_idx].set(x_temp)
    x_stat_rep = x_stat[:, None, :] * jnp.asarray(valid_np)[:, :, None]
    x_cat = jnp.concatenate([x_temp_pad, x_stat_rep], axis=-1).reshape(B * T, cin)

    row_tile = _pick_row_tile(B * T)
    bt_pad = _round_up(B * T, row_tile)
    x_cat_pad = jnp.pad(x_cat, ((0, bt_pad - B * T), (0, 0)))
    valid_col_np = np.zeros((bt_pad, 1), np.float32)
    valid_col_np[:B * T, 0] = valid_np.reshape(-1)
    valid_col = jnp.asarray(valid_col_np)

    # Lane-dense (Cout padded to 128) parameters; padded gamma/beta/bias are
    # zero so padded output columns stay exactly zero.
    w_t = _pad_last(params["w_temp"], temp_outp)
    b_t = _pad_last(params["b_temp"], temp_outp)
    g_t = _pad_last(params["g_temp"], temp_outp)
    bt_t = _pad_last(params["beta_temp"], temp_outp)
    w_s = _pad_last(params["w_stat"], stat_outp)
    b_s = _pad_last(params["b_stat"], stat_outp)
    g_s = _pad_last(params["g_stat"], stat_outp)
    bt_s = _pad_last(params["beta_stat"], stat_outp)

    # Pass 1: BN stats (temp path) + full static path, one launch.
    bn_affine, x_stat_out = bn_stats_and_static(
        x_cat_pad, valid_col, w_t, b_t, g_t, bt_t,
        x_stat, w_s, b_s, g_s, bt_s, n_valid=n_valid, row_tile=row_tile)

    # Pass 2: per-sequence attention.  temp_attn / mask go in as bf16 to halve
    # the dominant (B,T,T) HBM traffic; softmax math stays in f32.
    ta_bf16 = temp_attn.astype(jnp.bfloat16)
    mask_bf16 = mask_repeat.astype(jnp.bfloat16)
    out_pad = attention_per_sequence(
        x_cat_pad, valid_col, w_t, b_t, bn_affine, ta_bf16, mask_bf16,
        B=B, T=T, d_model=temp_out)

    # Glue: pack_padded_sequences + drop channel padding.
    x_temp_out = out_pad.reshape(B, T, temp_outp)[:, :, :temp_out][
        batch_idx, pos_idx]
    x_stat_out = x_stat_out[:, :stat_out]
    return x_temp_out, x_stat_out


# ----------------------------------------------------------------------------
# Pure-JAX reference (correctness check only)
# ----------------------------------------------------------------------------
def _ref_mlp(x, w, b, g, beta):
    y = x @ w + b
    mean = jnp.mean(y, axis=0, keepdims=True)
    var = jnp.mean((y - mean) ** 2, axis=0, keepdims=True)
    y = (y - mean) / jnp.sqrt(var + BN_EPS) * g + beta
    return jnp.where(y >= 0, y, LEAKY_SLOPE * y)


def simta_plus_reference(params, x_temp, x_stat, temp_attn, mask_repeat, lengths):
    lengths = [int(l) for l in lengths]
    B, T, _ = temp_attn.shape
    batch_idx, pos_idx = _pack_indices(lengths)
    x_stat_repeat = x_stat[batch_idx]
    x_cat = jnp.concatenate([x_temp, x_stat_repeat], axis=-1)
    x_h = _ref_mlp(x_cat, params["w_temp"], params["b_temp"],
                   params["g_temp"], params["beta_temp"])
    x_pad = jnp.zeros((B, T, x_h.shape[-1]), jnp.float32).at[
        batch_idx, pos_idx].set(x_h)
    d = jnp.float32(x_pad.shape[-1])
    qk = jnp.einsum("btd,bsd->bts", x_pad, x_pad) / jnp.sqrt(d)
    sm = jax.nn.softmax(qk, axis=-1)
    attn = jnp.where(mask_repeat, sm + temp_attn, 0.0)
    x_out = jnp.einsum("bts,bsd->btd", attn, x_pad)
    x_temp_out = x_out[batch_idx, pos_idx]
    x_stat_out = _ref_mlp(x_stat, params["w_stat"], params["b_stat"],
                          params["g_stat"], params["beta_stat"])
    return x_temp_out, x_stat_out


# ----------------------------------------------------------------------------
if __name__ == "__main__":
    B = 2
    T = 8
    lengths = [8, 6]              # static per-example sequence lengths
    N = sum(lengths)              # packed row count
    TEMP_IN, STAT_IN = 8, 4
    TEMP_OUT, STAT_OUT = 32, 16   # drop_prob=0 -> no Dropout layer in MLPLayer

    key = jax.random.PRNGKey(0)
    keys = jax.random.split(key, 12)

    # Weights stored as (in, out); PyTorch Linear stores (out, in) — layout only.
    params = {
        "w_temp": 0.1 * jax.random.normal(keys[0], (TEMP_IN + STAT_IN, TEMP_OUT), jnp.float32),
        "b_temp": 0.1 * jax.random.normal(keys[1], (1, TEMP_OUT), jnp.float32),
        "g_temp": 1.0 + 0.1 * jax.random.normal(keys[2], (1, TEMP_OUT), jnp.float32),
        "beta_temp": 0.1 * jax.random.normal(keys[3], (1, TEMP_OUT), jnp.float32),
        "w_stat": 0.1 * jax.random.normal(keys[4], (STAT_IN, STAT_OUT), jnp.float32),
        "b_stat": 0.1 * jax.random.normal(keys[5], (1, STAT_OUT), jnp.float32),
        "g_stat": 1.0 + 0.1 * jax.random.normal(keys[6], (1, STAT_OUT), jnp.float32),
        "beta_stat": 0.1 * jax.random.normal(keys[7], (1, STAT_OUT), jnp.float32),
    }

    # Inputs: packed temporal features, static features, additive attention,
    # and the mask_repeat the module receives (length-validity outer product).
    x_temp = jax.random.normal(keys[8], (N, TEMP_IN), jnp.float32)
    x_stat = jax.random.normal(keys[9], (B, STAT_IN), jnp.float32)
    temp_attn = 0.1 * jax.random.normal(keys[10], (B, T, T), jnp.float32)
    valid_b = jnp.arange(T)[None, :] < jnp.asarray(lengths, jnp.int32)[:, None]
    mask_repeat = valid_b[:, :, None] & valid_b[:, None, :]        # (B, T, T) bool

    out_temp, out_stat = simta_plus_forward(params, x_temp, x_stat,
                                            temp_attn, mask_repeat, lengths)
    jax.block_until_ready((out_temp, out_stat))

    ref_temp, ref_stat = simta_plus_reference(params, x_temp, x_stat,
                                              temp_attn, mask_repeat, lengths)

    assert out_temp.shape == (N, TEMP_OUT), out_temp.shape
    assert out_stat.shape == (B, STAT_OUT), out_stat.shape
    # temp path: bf16 MXU matmuls + bf16 temp_attn + approx softmax reciprocal
    # -> loose tolerance vs the all-f32 reference.
    np.testing.assert_allclose(np.asarray(out_temp), np.asarray(ref_temp),
                               rtol=5e-2, atol=5e-2)
    np.testing.assert_allclose(np.asarray(out_stat), np.asarray(ref_stat),
                               rtol=1e-5, atol=1e-5)

    print("KERNEL_OK")
</pallas_src>

<mosaic_0001>
module attributes {stable_mosaic.version = 11 : i64} {
  func.func @_stats_static_kernel(%arg0: i32, %arg1: memref<8x12xf32, #tpu.memory_space<vmem>>, %arg2: memref<8x1xf32, #tpu.memory_space<vmem>>, %arg3: memref<12x128xf32, #tpu.memory_space<vmem>>, %arg4: memref<1x128xf32, #tpu.memory_space<vmem>>, %arg5: memref<1x128xf32, #tpu.memory_space<vmem>>, %arg6: memref<1x128xf32, #tpu.memory_space<vmem>>, %arg7: memref<2x4xf32, #tpu.memory_space<vmem>>, %arg8: memref<4x128xf32, #tpu.memory_space<vmem>>, %arg9: memref<1x128xf32, #tpu.memory_space<vmem>>, %arg10: memref<1x128xf32, #tpu.memory_space<vmem>>, %arg11: memref<1x128xf32, #tpu.memory_space<vmem>>, %arg12: memref<2x128xf32, #tpu.memory_space<vmem>>, %arg13: memref<2x128xf32, #tpu.memory_space<vmem>>, %arg14: memref<1x128xf32, #tpu.memory_space<vmem>>, %arg15: memref<1x128xf32, #tpu.memory_space<vmem>>) attributes {dimension_semantics = [#tpu.dimension_semantics<arbitrary>], iteration_bounds = array<i64: 2>, scalar_prefetch = 0 : i64, scratch_operands = 2 : i64, tpu.core_type = #tpu.core_type<tc>, window_params = [{transform_indices = @transform_0, window_bounds = array<i64: 8, 12>}, {transform_indices = @transform_1, window_bounds = array<i64: 8, 1>}, {pipeline_mode = #tpu.pipeline_mode<synchronous>, transform_indices = @transform_2, window_bounds = array<i64: 12, 128>}, {pipeline_mode = #tpu.pipeline_mode<synchronous>, transform_indices = @transform_3, window_bounds = array<i64: 1, 128>}, {pipeline_mode = #tpu.pipeline_mode<synchronous>, transform_indices = @transform_4, window_bounds = array<i64: 1, 128>}, {pipeline_mode = #tpu.pipeline_mode<synchronous>, transform_indices = @transform_5, window_bounds = array<i64: 1, 128>}, {pipeline_mode = #tpu.pipeline_mode<synchronous>, transform_indices = @transform_6, window_bounds = array<i64: 2, 4>}, {pipeline_mode = #tpu.pipeline_mode<synchronous>, transform_indices = @transform_7, window_bounds = array<i64: 4, 128>}, {pipeline_mode = #tpu.pipeline_mode<synchronous>, transform_indices = @transform_8, window_bounds = array<i64: 1, 128>}, {pipeline_mode = #tpu.pipeline_mode<synchronous>, transform_indices = @transform_9, window_bounds = array<i64: 1, 128>}, {pipeline_mode = #tpu.pipeline_mode<synchronous>, transform_indices = @transform_10, window_bounds = array<i64: 1, 128>}, {pipeline_mode = #tpu.pipeline_mode<synchronous>, transform_indices = @transform_11, window_bounds = array<i64: 2, 128>}, {pipeline_mode = #tpu.pipeline_mode<synchronous>, transform_indices = @transform_12, window_bounds = array<i64: 2, 128>}]} {
    %c0_i32 = arith.constant 0 : i32
    %0 = arith.cmpi eq, %arg0, %c0_i32 : i32
    %1 = arith.extui %0 : i1 to i32
    %c0_i32_0 = arith.constant 0 : i32
    %2 = arith.cmpi ne, %1, %c0_i32_0 : i32
    scf.if %2 {
      %cst_19 = arith.constant 0.000000e+00 : f32
      %26 = vector.broadcast %cst_19 : f32 to vector<1x128xf32>
      %c0_20 = arith.constant 0 : index
      %c0_21 = arith.constant 0 : index
      %27 = vector.load %arg14[%c0_20, %c0_21] : memref<1x128xf32, #tpu.memory_space<vmem>>, vector<1x128xf32>
      tpu.vector_store %arg14[%c0_20, %c0_21], %26 {strides = array<i32>} : memref<1x128xf32, #tpu.memory_space<vmem>>, vector<1x128xf32>,
      %cst_22 = arith.constant 0.000000e+00 : f32
      %28 = vector.broadcast %cst_22 : f32 to vector<1x128xf32>
      %c0_23 = arith.constant 0 : index
      %c0_24 = arith.constant 0 : index
      %29 = vector.load %arg15[%c0_23, %c0_24] : memref<1x128xf32, #tpu.memory_space<vmem>>, vector<1x128xf32>
      tpu.vector_store %arg15[%c0_23, %c0_24], %28 {strides = array<i32>} : memref<1x128xf32, #tpu.memory_space<vmem>>, vector<1x128xf32>,
      %c0_25 = arith.constant 0 : index
      %c0_26 = arith.constant 0 : index
      %30 = vector.load %arg7[%c0_25, %c0_26] : memref<2x4xf32, #tpu.memory_space<vmem>>, vector<2x4xf32>
      %c0_27 = arith.constant 0 : index
      %c0_28 = arith.constant 0 : index
      %31 = vector.load %arg8[%c0_27, %c0_28] : memref<4x128xf32, #tpu.memory_space<vmem>>, vector<4x128xf32>
      %cst_29 = arith.constant dense<0.000000e+00> : vector<2x128xf32>
      %32 = tpu.matmul %30, %31, %cst_29 {dimension_numbers = #tpu.dot_dimension_numbers<[1], [0], [0], [1], [0, 0, 1, 1], [], []>} : vector<2x4xf32>, vector<4x128xf32>, vector<2x128xf32> -> vector<2x128xf32>
      %c0_30 = arith.constant 0 : index
      %c0_31 = arith.constant 0 : index
      %33 = vector.load %arg9[%c0_30, %c0_31] : memref<1x128xf32, #tpu.memory_space<vmem>>, vector<1x128xf32>
      %34 = vector.broadcast %33 : vector<1x128xf32> to vector<2x128xf32>
      %35 = arith.addf %32, %34 : vector<2x128xf32>
      %cst_32 = arith.constant dense<0.000000e+00> : vector<128xf32>
      %36 = vector.multi_reduction <add>, %35, %cst_32 [0] : vector<2x128xf32> to vector<128xf32>
      %37 = vector.shape_cast %36 : vector<128xf32> to vector<1x128xf32>
      %cst_33 = arith.constant 2.000000e+00 : f32
      %38 = vector.broadcast %cst_33 : f32 to vector<1x128xf32>
      %39 = arith.divf %37, %38 : vector<1x128xf32>
      %40 = vector.broadcast %39 : vector<1x128xf32> to vector<2x128xf32>
      %41 = arith.subf %35, %40 : vector<2x128xf32>
      %42 = arith.mulf %41, %41 : vector<2x128xf32>
      %cst_34 = arith.constant dense<0.000000e+00> : vector<128xf32>
      %43 = vector.multi_reduction <add>, %42, %cst_34 [0] : vector<2x128xf32> to vector<128xf32>
      %44 = vector.shape_cast %43 : vector<128xf32> to vector<1x128xf32>
      %cst_35 = arith.constant 2.000000e+00 : f32
      %45 = vector.broadcast %cst_35 : f32 to vector<1x128xf32>
      %46 = arith.divf %44, %45 : vector<1x128xf32>
      %cst_36 = arith.constant 9.99999974E-6 : f32
      %47 = vector.broadcast %cst_36 : f32 to vector<1x128xf32>
      %48 = arith.addf %46, %47 : vector<1x128xf32>
      %49 = math.rsqrt %48 : vector<1x128xf32>
      %50 = vector.broadcast %49 : vector<1x128xf32> to vector<2x128xf32>
      %51 = arith.mulf %41, %50 : vector<2x128xf32>
      %c0_37 = arith.constant 0 : index
      %c0_38 = arith.constant 0 : index
      %52 = vector.load %arg10[%c0_37, %c0_38] : memref<1x128xf32, #tpu.memory_space<vmem>>, vector<1x128xf32>
      %53 = vector.broadcast %52 : vector<1x128xf32> to vector<2x128xf32>
      %54 = arith.mulf %51, %53 : vector<2x128xf32>
      %c0_39 = arith.constant 0 : index
      %c0_40 = arith.constant 0 : index
      %55 = vector.load %arg11[%c0_39, %c0_40] : memref<1x128xf32, #tpu.memory_space<vmem>>, vector<1x128xf32>
      %56 = vector.broadcast %55 : vector<1x128xf32> to vector<2x128xf32>
      %57 = arith.addf %54, %56 : vector<2x128xf32>
      %cst_41 = arith.constant 0.000000e+00 : f32
      %58 = vector.broadcast %cst_41 : f32 to vector<2x128xf32>
      %59 = arith.cmpf oge, %57, %58 : vector<2x128xf32>
      %cst_42 = arith.constant 0.00999999977 : f32
      %60 = vector.broadcast %cst_42 : f32 to vector<2x128xf32>
      %61 = arith.mulf %60, %57 : vector<2x128xf32>
      %62 = arith.select %59, %57, %61 : vector<2x128xi1>, vector<2x128xf32>
      %c0_43 = arith.constant 0 : index
      %c0_44 = arith.constant 0 : index
      %63 = vector.load %arg13[%c0_43, %c0_44] : memref<2x128xf32, #tpu.memory_space<vmem>>, vector<2x128xf32>
      tpu.vector_store %arg13[%c0_43, %c0_44], %62 {strides = array<i32>} : memref<2x128xf32, #tpu.memory_space<vmem>>, vector<2x128xf32>,
    } else {
    }
    %c0 = arith.constant 0 : index
    %c0_1 = arith.constant 0 : index
    %3 = vector.load %arg1[%c0, %c0_1] : memref<8x12xf32, #tpu.memory_space<vmem>>, vector<8x12xf32>
    %c0_2 = arith.constant 0 : index
    %c0_3 = arith.constant 0 : index
    %4 = vector.load %arg3[%c0_2, %c0_3] : memref<12x128xf32, #tpu.memory_space<vmem>>, vector<12x128xf32>
    %cst = arith.constant dense<0.000000e+00> : vector<8x128xf32>
    %5 = tpu.matmul %3, %4, %cst {dimension_numbers = #tpu.dot_dimension_numbers<[1], [0], [0], [1], [0, 0, 1, 1], [], []>} : vector<8x12xf32>, vector<12x128xf32>, vector<8x128xf32> -> vector<8x128xf32>
    %c0_4 = arith.constant 0 : index
    %c0_5 = arith.constant 0 : index
    %6 = vector.load %arg4[%c0_4, %c0_5] : memref<1x128xf32, #tpu.memory_space<vmem>>, vector<1x128xf32>
    %7 = vector.broadcast %6 : vector<1x128xf32> to vector<8x128xf32>
    %8 = arith.addf %5, %7 : vector<8x128xf32>
    %c0_6 = arith.constant 0 : index
    %c0_7 = arith.constant 0 : index
    %9 = vector.load %arg2[%c0_6, %c0_7] : memref<8x1xf32, #tpu.memory_space<vmem>>, vector<8x1xf32>
    %10 = vector.broadcast %9 : vector<8x1xf32> to vector<8x128xf32>
    %11 = arith.mulf %8, %10 : vector<8x128xf32>
    %c0_8 = arith.constant 0 : index
    %c0_9 = arith.constant 0 : index
    %12 = vector.load %arg14[%c0_8, %c0_9] : memref<1x128xf32, #tpu.memory_space<vmem>>, vector<1x128xf32>
    %cst_10 = arith.constant dense<0.000000e+00> : vector<128xf32>
    %13 = vector.multi_reduction <add>, %11, %cst_10 [0] : vector<8x128xf32> to vector<128xf32>
    %14 = vector.shape_cast %13 : vector<128xf32> to vector<1x128xf32>
    %15 = arith.addf %12, %14 : vector<1x128xf32>
    %c0_11 = arith.constant 0 : index
    %c0_12 = arith.constant 0 : index
    %16 = vector.load %arg14[%c0_11, %c0_12] : memref<1x128xf32, #tpu.memory_space<vmem>>, vector<1x128xf32>
    tpu.vector_store %arg14[%c0_11, %c0_12], %15 {strides = array<i32>} : memref<1x128xf32, #tpu.memory_space<vmem>>, vector<1x128xf32>,
    %c0_13 = arith.constant 0 : index
    %c0_14 = arith.constant 0 : index
    %17 = vector.load %arg15[%c0_13, %c0_14] : memref<1x128xf32, #tpu.memory_space<vmem>>, vector<1x128xf32>
    %18 = arith.mulf %11, %8 : vector<8x128xf32>
    %cst_15 = arith.constant dense<0.000000e+00> : vector<128xf32>
    %19 = vector.multi_reduction <add>, %18, %cst_15 [0] : vector<8x128xf32> to vector<128xf32>
    %20 = vector.shape_cast %19 : vector<128xf32> to vector<1x128xf32>
    %21 = arith.addf %17, %20 : vector<1x128xf32>
    %c0_16 = arith.constant 0 : index
    %c0_17 = arith.constant 0 : index
    %22 = vector.load %arg15[%c0_16, %c0_17] : memref<1x128xf32, #tpu.memory_space<vmem>>, vector<1x128xf32>
    tpu.vector_store %arg15[%c0_16, %c0_17], %21 {strides = array<i32>} : memref<1x128xf32, #tpu.memory_space<vmem>>, vector<1x128xf32>,
    %c1_i32 = arith.constant 1 : i32
    %23 = arith.cmpi eq, %arg0, %c1_i32 : i32
    %24 = arith.extui %23 : i1 to i32
    %c0_i32_18 = arith.constant 0 : i32
    %25 = arith.cmpi ne, %24, %c0_i32_18 : i32
    scf.if %25 {
      %c0_19 = arith.constant 0 : index
      %c0_20 = arith.constant 0 : index
      %26 = vector.load %arg14[%c0_19, %c0_20] : memref<1x128xf32, #tpu.memory_space<vmem>>, vector<1x128xf32>
      %cst_21 = arith.constant 0.0714285746 : f32
      %27 = vector.broadcast %cst_21 : f32 to vector<1x128xf32>
      %28 = arith.mulf %26, %27 : vector<1x128xf32>
      %c0_22 = arith.constant 0 : index
      %c0_23 = arith.constant 0 : index
      %29 = vector.load %arg15[%c0_22, %c0_23] : memref<1x128xf32, #tpu.memory_space<vmem>>, vector<1x128xf32>
      %cst_24 = arith.constant 0.0714285746 : f32
      %30 = vector.broadcast %cst_24 : f32 to vector<1x128xf32>
      %31 = arith.mulf %29, %30 : vector<1x128xf32>
      %32 = arith.mulf %28, %28 : vector<1x128xf32>
      %33 = arith.subf %31, %32 : vector<1x128xf32>
      %c0_25 = arith.constant 0 : index
      %c0_26 = arith.constant 0 : index
      %34 = vector.load %arg5[%c0_25, %c0_26] : memref<1x128xf32, #tpu.memory_space<vmem>>, vector<1x128xf32>
      %cst_27 = arith.constant 9.99999974E-6 : f32
      %35 = vector.broadcast %cst_27 : f32 to vector<1x128xf32>
      %36 = arith.addf %33, %35 : vector<1x128xf32>
      %37 = math.rsqrt %36 : vector<1x128xf32>
      %38 = arith.mulf %34, %37 : vector<1x128xf32>
      %c0_28 = arith.constant 0 : index
      %c0_29 = arith.constant 0 : index
      %39 = vector.load %arg6[%c0_28, %c0_29] : memref<1x128xf32, #tpu.memory_space<vmem>>, vector<1x128xf32>
      %40 = arith.mulf %28, %38 : vector<1x128xf32>
      %41 = arith.subf %39, %40 : vector<1x128xf32>
      %42 = tpu.concatenate %38, %41 in 0 : vector<1x128xf32>, vector<1x128xf32> -> vector<2x128xf32>
      %c0_30 = arith.constant 0 : index
      %c0_31 = arith.constant 0 : index
      %43 = vector.load %arg12[%c0_30, %c0_31] : memref<2x128xf32, #tpu.memory_space<vmem>>, vector<2x128xf32>
      tpu.vector_store %arg12[%c0_30, %c0_31], %42 {strides = array<i32>} : memref<2x128xf32, #tpu.memory_space<vmem>>, vector<2x128xf32>,
    } else {
    }
    return
  }
  func.func @transform_0(%arg0: i32) -> (i32, i32) {
    %c0_i32 = arith.constant 0 : i32
    %c0_i32_0 = arith.constant 0 : i32
    return %arg0, %c0_i32 : i32, i32
  }
  func.func @transform_1(%arg0: i32) -> (i32, i32) {
    %c0_i32 = arith.constant 0 : i32
    %c0_i32_0 = arith.constant 0 : i32
    return %arg0, %c0_i32 : i32, i32
  }
  func.func @transform_2(%arg0: i32) -> (i32, i32) {
    %c0_i32 = arith.constant 0 : i32
    %c0_i32_0 = arith.constant 0 : i32
    %c0_i32_1 = arith.constant 0 : i32
    return %c0_i32, %c0_i32_0 : i32, i32
  }
  func.func @transform_3(%arg0: i32) -> (i32, i32) {
    %c0_i32 = arith.constant 0 : i32
    %c0_i32_0 = arith.constant 0 : i32
    %c0_i32_1 = arith.constant 0 : i32
    return %c0_i32, %c0_i32_0 : i32, i32
  }
  func.func @transform_4(%arg0: i32) -> (i32, i32) {
    %c0_i32 = arith.constant 0 : i32
    %c0_i32_0 = arith.constant 0 : i32
    %c0_i32_1 = arith.constant 0 : i32
    return %c0_i32, %c0_i32_0 : i32, i32
  }
  func.func @transform_5(%arg0: i32) -> (i32, i32) {
    %c0_i32 = arith.constant 0 : i32
    %c0_i32_0 = arith.constant 0 : i32
    %c0_i32_1 = arith.constant 0 : i32
    return %c0_i32, %c0_i32_0 : i32, i32
  }
  func.func @transform_6(%arg0: i32) -> (i32, i32) {
    %c0_i32 = arith.constant 0 : i32
    %c0_i32_0 = arith.constant 0 : i32
    %c0_i32_1 = arith.constant 0 : i32
    return %c0_i32, %c0_i32_0 : i32, i32
  }
  func.func @transform_7(%arg0: i32) -> (i32, i32) {
    %c0_i32 = arith.constant 0 : i32
    %c0_i32_0 = arith.constant 0 : i32
    %c0_i32_1 = arith.constant 0 : i32
    return %c0_i32, %c0_i32_0 : i32, i32
  }
  func.func @transform_8(%arg0: i32) -> (i32, i32) {
    %c0_i32 = arith.constant 0 : i32
    %c0_i32_0 = arith.constant 0 : i32
    %c0_i32_1 = arith.constant 0 : i32
    return %c0_i32, %c0_i32_0 : i32, i32
  }
  func.func @transform_9(%arg0: i32) -> (i32, i32) {
    %c0_i32 = arith.constant 0 : i32
    %c0_i32_0 = arith.constant 0 : i32
    %c0_i32_1 = arith.constant 0 : i32
    return %c0_i32, %c0_i32_0 : i32, i32
  }
  func.func @transform_10(%arg0: i32) -> (i32, i32) {
    %c0_i32 = arith.constant 0 : i32
    %c0_i32_0 = arith.constant 0 : i32
    %c0_i32_1 = arith.constant 0 : i32
    return %c0_i32, %c0_i32_0 : i32, i32
  }
  func.func @transform_11(%arg0: i32) -> (i32, i32) {
    %c0_i32 = arith.constant 0 : i32
    %c0_i32_0 = arith.constant 0 : i32
    %c0_i32_1 = arith.constant 0 : i32
    return %c0_i32, %c0_i32_0 : i32, i32
  }
  func.func @transform_12(%arg0: i32) -> (i32, i32) {
    %c0_i32 = arith.constant 0 : i32
    %c0_i32_0 = arith.constant 0 : i32
    %c0_i32_1 = arith.constant 0 : i32
    return %c0_i32, %c0_i32_0 : i32, i32
  }
}

</mosaic_0001>

<bundles_post_ra>
// kernel: tpu_custom_call.1
= control target key start
LH: loop header
LB: loop body
LE: loop exit
PB: predicated region body
PF: predicated region fallthrough
CT: control target
= control target key end

     0   :  { %18 = vsyncpa [#allocation5], 0  ;;  %s1233_s0 = inlined_call_operand.vmem [shape: f32[16,12], index: 0, kind: input, shape index: {}]   ;;  %s1234_s1 = inlined_call_operand.vmem [shape: f32[16,1], index: 1, kind: input, shape index: {}]   ;;  %s1235_s2 = inlined_call_operand.hbm [shape: f32[12,128], index: 2, kind: input, shape index: {}]   ;;  %s1236_s3 = inlined_call_operand.hbm [shape: f32[1,128], index: 3, kind: input, shape index: {}]   ;;  %s1237_s4 = inlined_call_operand.vmem [shape: f32[1,128], index: 4, kind: input, shape index: {}]   ;;  %s1238_s5 = inlined_call_operand.vmem [shape: f32[1,128], index: 5, kind: input, shape index: {}]   ;;  %s1239_s6 = inlined_call_operand.vmem [shape: f32[2,4], index: 6, kind: input, shape index: {}]   ;;  %s1240_s7 = inlined_call_operand.vmem [shape: f32[4,128], index: 7, kind: input, shape index: {}]   ;;  %s1241_s8 = inlined_call_operand.vmem [shape: f32[1,128], index: 8, kind: input, shape index: {}]   ;;  %s1242_s9 = inlined_call_operand.vmem [shape: f32[1,128], index: 9, kind: input, shape index: {}]   ;;  %s1243_s10 = inlined_call_operand.vmem [shape: f32[1,128], index: 10, kind: input, shape index: {}]   ;;  %s1244_s11 = inlined_call_operand.hbm [shape: f32[2,128], index: 11, kind: output, shape index: {0}]   ;;  %s1245_s12 = inlined_call_operand.hbm [shape: f32[2,128], index: 12, kind: output, shape index: {1}]  }
   0x1   :  { %19 = vsyncpa [#allocation8], 0 }
   0x2   :  { %20 = vsyncpa [#allocation6], 0 }
   0x3   :  { %21 = vsyncpa [#allocation11], 0  ;;  %s1117_s21 = smov 0  }
   0x4 LB: > { %s1123_s22 = sadd.s32 4294967295, %s1039_s21   ;;  %p820_p0 = scmp.ge.s32.totalorder %s1039_s21, 1  ;;  %s1039_s21 = sphi %s1117_s21, %s27_s21  }
   0x5   : > { %p315_p1 = scmp.lt.s32.totalorder %s1039_s21, 3  ;;  %p821_p2 = scmp.ne.s32.totalorder %s1123_s22, 0 }
   0x6   : > { %s1041_s23 = smov [#allocation4]   ;;  %p885_p4 = scmp.eq.s32.totalorder %s1123_s22, 0 }
   0x7   : > { %s327_s24 = sshll.u32 %s1041_s23, 4  ;;  %p1128_p3 = pnand %p820_p0, %p315_p1  ;;  %s328_s24 = int_to_ptr.vmem [resolvable:$true] %s327_s24 }
   0x8   : > { %s1042_s26 = smov [#allocation7]   ;;  %s928_s29 = scalar_lea.vmem %s328_s24, 256 }
   0x9   : > { %p878_p5 = pneg %p1128_p3  ;;  %s341_s27 = sshll.u32 %s1042_s26, 4  ;;  %s342_s27 = int_to_ptr.vmem [resolvable:$true] %s341_s27 }
   0xa   : > { %p929_p8 = scmp.ne.s32.totalorder %s328_s24, %s928_s29  ;;  %p936_p11 = scmp.lt.s32.totalorder %s328_s24, %s328_s24 }
   0xb   : > { %p1137_p6 = pnand %p885_p4, %p878_p5  ;;  %p937_p12 = scmp.lt.s32.totalorder %s928_s29, %s928_s29 }
   0xd   : > { %p919_p7 = pneg %p1137_p6  ;;  %p938_p13 = por %p937_p12, %p936_p11 }
   0xf   : > { %p931_p9 = pnand %p929_p8, %p919_p7 }
  0x11   : > { %p932_p10 = pneg %p931_p9 }
  0x13   : > { %p939_p0 = pnand %p938_p13, %p932_p10 }
  0x15   : > { %942 = shalt.err (!%p939_p0)
}
  0x16   : > { %s1043_s30 = smov 128   ;;  %s1044_s13 = smov 8  }
  0x17   : > { %881 = dma.hbm_to_vmem [thread:$0]  (!%p1137_p6), %s1235_s2, 256, %s328_s24, [#allocation5], %s1043_s30, %s1043_s30, %s1044_s13  }
  0x18   : > { %s954_s16 = scalar_lea.vmem %s342_s27, 16  ;;  %s961_s17 = scalar_lea.vmem %s342_s27, 32 }
  0x19   : > { %p955_p1 = scmp.ne.s32.totalorder %s342_s27, %s954_s16  ;;  %p962_p9 = scmp.lt.s32.totalorder %s342_s27, %s342_s27 }
  0x1a   : > { %p963_p11 = scmp.lt.s32.totalorder %s961_s17, %s954_s16 }
  0x1b   : > { %p957_p5 = pnand %p955_p1, %p919_p7 }
  0x1c   : > { %p964_p10 = por %p963_p11, %p962_p9 }
  0x1d   : > { %p958_p8 = pneg %p957_p5 }
  0x1f   : > { %p965_p12 = pnand %p964_p10, %p958_p8 }
  0x21   : > { %968 = shalt.err (!%p965_p12)
}
  0x22   : > { %884 = dma.hbm_to_vmem [thread:$0]  (!%p1137_p6), %s1236_s3, 16, %s342_s27, [#allocation8]  }
  0x23   : > { %389 = sbr.rel (%p1128_p3) target bundleno = 591 (0x24f), region = 64 }
  0x28   : > { %1022 = dma.done.wait (%p885_p4), [#allocation5], 256  }
  0x29   : > { %1024 = vsyncadd (%p885_p4), [#allocation5], 4294967040 }
  0x2a   : > { %1026 = dma.done.wait (%p885_p4), [#allocation8], 16  }
  0x2b   : > { %1028 = vsyncadd (%p885_p4), [#allocation8], 4294967280  ;;  %p433_p7 = scmp.lt.s32.totalorder %s1123_s22, 1 }
  0x2c   : > { %444 = sbr.rel (%p821_p2) target bundleno = 307 (0x133), region = 76 }
  0x2d   : > { %s434_s20 = scalar_select %p433_p7, %s1123_s22, 1 }
  0x2f   : > { %s827_s23 = sshll.u32 %s434_s20, 3 }
  0x30   : > { %s1174_s26 = scalar_lea.vmem %s1233_s0, %s827_s23  ;;  %s1179_s29 = scalar_lea.vmem %s1234_s1, %s827_s23 }
  0x31   : > { %v448_v0 = vld [vmem:[%s1240_s7] sm:$0xf]  ;;  %vm460_vm0 = vcmask 1043456   ;;  %vm456_vm1 = vcmask 31744   ;;  %v1045_v1 = vmov 0.0   ;;  %vm1046_vm2 = vmmov 0  }
  0x32   : > { %445 = vst [vmem:[#allocation2] sm:$0x1] %v1045_v1  ;;  %446 = vst [vmem:[#allocation3] sm:$0x1] %v1045_v1  ;;  %850 = vmatprep.subr.mxu0 %v1045_v1  ;;  %852 = vmatprep.mubr.msk.f32.mxu0 %vm1046_vm2, %v1045_v1  ;;  %v447_v2 = vld [vmem:[%s1239_s6] sm:$0x3] }
  0x33   : > { %851 = vmatpush3.msk.msra.mxu0 %vm460_vm0, %v448_v0  ;;  %v830_v3 = vld [vmem:[%s1241_s8] ss:$0 sm:$0xff]  ;;  %vm534_vm3 = vcmask 1041408  }
  0x34   : > { %853 = vmatmul.mubr.msk.f32.vlgmr.msra.gmra.mxu0 %vm456_vm1, %v447_v2  ;;  %v833_v27 = vld [vmem:[%s1242_s9] ss:$0 sm:$0xff] }
  0x35   : > { %v834_v29 = vld [vmem:[%s1243_s10] ss:$0 sm:$0xff] }
  0xf4   : > { %v530_v4 = vpop.f32.mrf.mxu0 }
  0xf5   : > { %v531_v5 = vadd.f32 %v830_v3, %v530_v4 }
  0xf6   : > { %v854_v6 = vpop.f32.mrf.mxu0 }
  0xf7   : > { %v535_v7 = vsel %vm534_vm3, %v531_v5, 0.0 }
  0xf8   : > { %v536_v8 = vrot.slane %v535_v7, 4 }
  0xfa   : > { %v537_v9 = vadd.f32 %v536_v8, %v535_v7 }
  0xfc   : > { %v538_v10 = vrot.slane %v537_v9, 2 }
  0xfe   : > { %v539_v11 = vadd.f32 %v538_v10, %v537_v9 }
 0x100   : > { %v540_v12 = vrot.slane %v539_v11, 1 }
 0x102   : > { %v541_v13 = vadd.f32 %v540_v12, %v539_v11 }
 0x104   : > { %v543_v14 = vmul.f32 0.5, %v541_v13 }
 0x106   : > { %v544_v15 = vsub.f32 %v531_v5, %v543_v14 }
 0x108   : > { %v545_v16 = vmul.f32 %v544_v15, %v544_v15 }
 0x10a   : > { %v546_v17 = vsel %vm534_vm3, %v545_v16, 0.0 }
 0x10b   : > { %v547_v18 = vrot.slane %v546_v17, 4 }
 0x10d   : > { %v548_v19 = vadd.f32 %v547_v18, %v546_v17 }
 0x10f   : > { %v549_v20 = vrot.slane %v548_v19, 2 }
 0x111   : > { %v550_v21 = vadd.f32 %v549_v20, %v548_v19 }
 0x113   : > { %v551_v22 = vrot.slane %v550_v21, 1 }
 0x115   : > { %v552_v23 = vadd.f32 %v551_v22, %v550_v21 }
 0x117   : > { %v553_v24 = vmul.f32 0.5, %v552_v23 }
 0x119   : > { %v554_v25 = vadd.f32 1e-05, %v553_v24 }
 0x11b   : > { %912 = vrsqrt.f32 %v554_v25 }
 0x128   : > { %v913_v26 = vpop.eup %912 }
 0x129   : > { %v556_v28 = vmul.f32 %v913_v26, %v544_v15 }
 0x12b   : > { %v564_v30 = vmul.f32 %v833_v27, %v556_v28 }
 0x12d   : > { %v572_v31 = vadd.f32 %v834_v29, %v564_v30 }
 0x12f   : > { %vm573_vm4 = vcmp.ge.f32.partialorder %v572_v31, 0.0  ;;  %v574_v32 = vmul.f32 0.01, %v572_v31 }
 0x131   : > { %v575_v33 = vsel %vm573_vm4, %v572_v31, %v574_v32 }
 0x132   : > { %576 = vst [vmem:[#allocation10] sm:$0x3] %v575_v33 }
 0x133 PF: > { %v579_v34 = vld [vmem:[#allocation4 + $0x8] sm:$0xf]  ;;  %vm591_vm5 = vcmask 1043456   ;;  %v1047_v35 = vmov 0.0   ;;  %v578_v36 = vld [vmem:[#allocation4] sm:$0xff]  ;;  %vm1048_vm6 = vmmov 0  }
 0x134   : > { %855 = vmatprep.subr.mxu0 %v1047_v35  ;;  %859 = vmatprep.mubr.msk.f32.mxu0 %vm1048_vm6, %v1047_v35  ;;  %v665_v37 = vld [vmem:[%s1179_s29] sm:$0xff]  ;;  %vm587_vm7 = vcmask 97280   ;;  %v1049_v39 = vmov 0   ;;  %v835_v40 = vld [vmem:[#allocation7] ss:$0 sm:$0xff]  ;;  %p838_p2 = scmp.ne.s32.totalorder %s1123_s22, 1 }
 0x135   : > { %856 = vmatpush3.msk.msra.mxu0 %vm591_vm5, %v579_v34  ;;  %v577_v38 = vld [vmem:[%s1174_s26] sm:$0xff]  ;;  %914 = vset.pattern.permute.xlu0 %v1049_v39 }
 0x136   : > { %857 = vmatprep.subr.mxu0 %v1047_v35  ;;  %668 = vperm.xlu0 %914, %v665_v37   ;;  %v672_v56 = vld [vmem:[#allocation2] sm:$0x1]  ;;  %v681_v59 = vld [vmem:[#allocation3] sm:$0x1] }
 0x137   : > { %858 = vmatpush3.msra.mxu0 %v578_v36 }
 0x138   : > { %860 = vmatmul.mubr.msk.f32.vlgmr.msra.gmra.mxu0 %vm587_vm7, %v577_v38 }
 0x1b1   : > { %v669_v42 = vpop.permute.xlu0 %668 }
 0x1f8   : > { %v661_v41 = vpop.f32.mrf.mxu0 }
 0x1f9   : > { %v662_v43 = vadd.f32 %v835_v40, %v661_v41 }
 0x1fa   : > { %v861_v44 = vpop.f32.mrf.mxu0 }
 0x1fb   : > { %v671_v45 = vmul.f32 %v669_v42, %v662_v43 }
 0x1fd   : > { %v673_v46 = vrot.slane %v671_v45, 4  ;;  %v682_v47 = vmul.f32 %v671_v45, %v662_v43 }
 0x1ff   : > { %v674_v48 = vadd.f32 %v673_v46, %v671_v45  ;;  %v683_v49 = vrot.slane %v682_v47, 4 }
 0x201   : > { %v675_v50 = vrot.slane %v674_v48, 2  ;;  %v684_v51 = vadd.f32 %v683_v49, %v682_v47 }
 0x203   : > { %v676_v52 = vadd.f32 %v675_v50, %v674_v48  ;;  %v685_v53 = vrot.slane %v684_v51, 2 }
 0x205   : > { %v677_v54 = vrot.slane %v676_v52, 1  ;;  %v686_v55 = vadd.f32 %v685_v53, %v684_v51 }
 0x207   : > { %v678_v57 = vadd.f32 %v677_v54, %v676_v52  ;;  %v687_v58 = vrot.slane %v686_v55, 1 }
 0x209   : > { %v679_v60 = vadd.f32 %v678_v57, %v672_v56  ;;  %v688_v61 = vadd.f32 %v687_v58, %v686_v55  ;;  %694 = sbr.rel (%p838_p2) target bundleno = 563 (0x233), region = 80 }
 0x20b   : > { %680 = vst [vmem:[#allocation2] sm:$0x1] %v679_v60  ;;  %v689_v62 = vadd.f32 %v688_v61, %v681_v59 }
 0x20d   : > { %690 = vst [vmem:[#allocation3] sm:$0x1] %v689_v62 }
 0x20e   : > { %v709_v6 = vlaneseq  ;;  %v701_v7 = vld [vmem:[%s1237_s4] sm:$0x1]  ;;  %vm714_vm8 = vcmask 1040384  }
 0x20f   : > { %v705_v11 = vld [vmem:[%s1238_s5] sm:$0x1] }
 0x210   : > { %v710_v8 = vshrl.u32 %v709_v6, 7 }
 0x212   : > { %v695_v63 = vld [vmem:[#allocation2] sm:$0x1]  ;;  %v711_v13 = vsub.s32 0, %v710_v8 }
 0x213   : > { %v696_v1 = vmul.f32 0.071428575, %v695_v63 }
 0x214   : > { %v697_v0 = vld [vmem:[#allocation3] sm:$0x1] }
 0x215   : > { %v698_v2 = vmul.f32 0.071428575, %v697_v0  ;;  %v699_v3 = vmul.f32 %v696_v1, %v696_v1 }
 0x217   : > { %v700_v4 = vsub.f32 %v698_v2, %v699_v3 }
 0x219   : > { %v702_v5 = vadd.f32 1e-05, %v700_v4 }
 0x21b   : > { %915 = vrsqrt.f32 %v702_v5 }
 0x228   : > { %v916_v9 = vpop.eup %915 }
 0x229   : > { %v704_v10 = vmul.f32 %v916_v9, %v701_v7 }
 0x22b   : > { %v706_v12 = vmul.f32 %v704_v10, %v696_v1 }
 0x22d   : > { %v707_v14 = vsub.f32 %v705_v11, %v706_v12 }
 0x22f   : > { %v712_v15 = vrot.slane %v707_v14, %v711_v13 }
 0x231   : > { %v715_v16 = vsel %vm714_vm8, %v704_v10, %v712_v15 }
 0x232   : > { %716 = vst [vmem:[#allocation9] sm:$0x3] %v715_v16 }
 0x233 PF: > { %p889_p3 = scmp.eq.s32.totalorder %s1123_s22, 1  ;;  %s1050_s28 = smov [#allocation9]  }
 0x234   : > { %s724_s29 = sshll.u32 %s1050_s28, 4  ;;  %s1051_s30 = smov [#allocation10]   ;;  %s725_s29 = int_to_ptr.vmem [resolvable:$true] %s724_s29 }
 0x235   : > { %s735_s13 = sshll.u32 %s1051_s30, 4  ;;  %s969_s14 = scalar_lea.vmem %s725_s29, 32  ;;  %s736_s13 = int_to_ptr.vmem [resolvable:$true] %s735_s13 }
 0x236   : > { %p970_p4 = scmp.ne.s32.totalorder %s725_s29, %s969_s14  ;;  %p976_p0 = scmp.lt.s32.totalorder %s725_s29, %s725_s29 }
 0x237   : > { %p977_p1 = scmp.lt.s32.totalorder %s969_s14, %s969_s14 }
 0x238   : > { %p971_p6 = pnand %p970_p4, %p889_p3 }
 0x239   : > { %p978_p5 = por %p977_p1, %p976_p0 }
 0x23a   : > { %p972_p13 = pneg %p971_p6 }
 0x23c   : > { %p979_p8 = pnand %p978_p5, %p972_p13 }
 0x23e   : > { %982 = shalt.err (!%p979_p8)
}
 0x23f   : > { %871 = dma.vmem_to_hbm [thread:$0]  (%p889_p3), %s725_s29, 32, %s1244_s11, [#allocation6]  }
 0x240   : > { %s993_s17 = scalar_lea.vmem %s736_s13, 32  ;;  %p1000_p12 = scmp.lt.s32.totalorder %s736_s13, %s736_s13 }
 0x241   : > { %p994_p9 = scmp.ne.s32.totalorder %s736_s13, %s993_s17  ;;  %p1001_p7 = scmp.lt.s32.totalorder %s993_s17, %s993_s17 }
 0x243   : > { %p995_p11 = pnand %p994_p9, %p889_p3  ;;  %p1002_p2 = por %p1001_p7, %p1000_p12 }
 0x245   : > { %p996_p10 = pneg %p995_p11 }
 0x247   : > { %p1003_p4 = pnand %p1002_p2, %p996_p10 }
 0x249   : > { %1006 = shalt.err (!%p1003_p4)
}
 0x24a   : > { %873 = dma.vmem_to_hbm [thread:$0]  (%p889_p3), %s736_s13, 32, %s1245_s12, [#allocation11]  }
 0x24b   : > { %1030 = dma.done.wait (%p889_p3), [#allocation6], 32  }
 0x24c   : > { %1032 = vsyncadd (%p889_p3), [#allocation6], 4294967264 }
 0x24d   : > { %1034 = dma.done.wait (%p889_p3), [#allocation11], 32  }
 0x24e   : > { %1036 = vsyncadd (%p889_p3), [#allocation11], 4294967264 }
 0x24f PF: > { %s27_s21 = sadd.s32 1, %s1039_s21  }
 0x250   : > { %p24_p6 = scmp.ge.s32.totalorder %s27_s21, 4  }
 0x252   :  { %26 = sbr.rel (!%p24_p6) target bundleno = 4 (0x4), region = 119 }
 0x257   :  { %752 = vsyncpa [#allocation5], 1 }
 0x258   :  { %754 = vsyncpa [#allocation5 + $0x1], 1 }
 0x259   :  { %755 = vsyncpa [#allocation8], 1 }
 0x25a   :  { %756 = vsyncpa [#allocation6], 1 }
 0x25b   :  { %758 = vsyncpa [#allocation6 + $0x1], 1 }
 0x25c   :  { %759 = vsyncpa [#allocation11], 1 }

</bundles_post_ra>
